<compile_context>
chip_gen: v5e
topology: v5e:2x2
jax: 0.10.0
libtpu: 0.0.40
codegen_flags: <defaults>
</compile_context>

<pallas_src>
import jax
import jax.numpy as jnp
import numpy as np
from jax.experimental import pallas as pl
from jax.experimental.pallas import tpu as pltpu


def _adaptive_bounds(in_size: int, out_size: int):
    """Static window boundaries matching torch.nn.AdaptiveAvgPool2d."""
    starts = [(i * in_size) // out_size for i in range(out_size)]
    ends = [-(-((i + 1) * in_size) // out_size) for i in range(out_size)]  # ceil
    return list(zip(starts, ends))


def _pool_matrix(H: int, W: int, patch: int, dtype) -> jax.Array:
    """(H*W, patch*patch) averaging matrix: M[h*W+w, p*patch+q] = 1/count if in window."""
    hb = _adaptive_bounds(H, patch)
    wb = _adaptive_bounds(W, patch)
    m = np.zeros((H * W, patch * patch), dtype=np.float32)
    for p, (h0, h1) in enumerate(hb):
        for q, (w0, w1) in enumerate(wb):
            inv = 1.0 / float((h1 - h0) * (w1 - w0))
            for h in range(h0, h1):
                for w in range(w0, w1):
                    m[h * W + w, p * patch + q] = inv
    return jnp.asarray(m, dtype=dtype)


def _pool_embed_kernel(x_ref, m_ref, o_ref):
    # x_ref: (1, TC, H*W)  channel tile of one batch element (H*W on lanes)
    # m_ref: (H*W, P*P)    static averaging matrix (resident; block index constant)
    # o_ref: (1, TC, P*P)
    o_ref[0] = jnp.dot(
        x_ref[0],
        m_ref[...],
        preferred_element_type=jnp.float32,      # f32 accumulation on the MXU
        precision=jax.lax.Precision.HIGHEST,     # full-precision f32 matmul path
    ).astype(o_ref.dtype)


def _choose_channel_tile(C, HW, PP, itemsize, budget_bytes=20 * 1024 * 1024):
    """Largest channel tile whose double-buffered footprint fits the budget."""
    def footprint(tc):
        # double-buffered input tile + pooling matrix + output tile
        return 2 * (tc * HW + HW * PP + tc * PP) * itemsize

    if footprint(C) <= budget_bytes:
        return C
    tc = (budget_bytes // (2 * itemsize) - HW * PP) // (HW + PP)
    tc = max(8, (tc // 8) * 8)  # sublane-aligned channel tile (ragged last block OK)
    return min(tc, C)


def pool_embedding(x_nchw: jax.Array, patch: int) -> jax.Array:
    """AdaptiveAvgPool2d((patch, patch)) + rearrange 'B C H W -> B (H W) C'."""
    B, C, H, W = x_nchw.shape
    HW, PP = H * W, patch * patch

    # Free reshape (merges trailing dims, no data movement): H*W onto lanes.
    x = x_nchw.reshape(B, C, HW)
    m = _pool_matrix(H, W, patch, x.dtype)

    itemsize = jnp.dtype(x.dtype).itemsize
    tc = _choose_channel_tile(C, HW, PP, itemsize)
    grid = (B, pl.cdiv(C, tc))

    pooled = pl.pallas_call(
        _pool_embed_kernel,
        out_shape=jax.ShapeDtypeStruct((B, C, PP), x.dtype),
        grid_spec=pltpu.PrefetchScalarGridSpec(
            num_scalar_prefetch=0,
            grid=grid,
            in_specs=[
                pl.BlockSpec((1, tc, HW), lambda b, c: (b, c, 0)),
                pl.BlockSpec((HW, PP), lambda b, c: (0, 0)),
            ],
            out_specs=pl.BlockSpec((1, tc, PP), lambda b, c: (b, c, 0)),
        ),
        compiler_params=pltpu.CompilerParams(
            dimension_semantics=("parallel", "parallel"),
            vmem_limit_bytes=32 * 1024 * 1024,
        ),
    )(x, m)

    # Tiny output transpose (B, C, P*P) -> (B, P*P, C); negligible HBM traffic
    # compared to the input read the kernel already did.
    return jnp.transpose(pooled, (0, 2, 1))


def _reference(x_nchw: jax.Array, patch: int) -> jax.Array:
    """Pure-JAX reference (adaptive avg pool + rearrange), f32 accumulation."""
    B, C, H, W = x_nchw.shape
    hb = _adaptive_bounds(H, patch)
    wb = _adaptive_bounds(W, patch)
    rows = []
    for p in range(patch):
        h0, h1 = hb[p]
        for q in range(patch):
            w0, w1 = wb[q]
            win = x_nchw[:, :, h0:h1, w0:w1].astype(jnp.float32)
            rows.append(jnp.mean(win, axis=(2, 3)))  # (B, C)
    return jnp.stack(rows, axis=1).astype(x_nchw.dtype)  # (B, P*P, C)


if __name__ == "__main__":
    key = jax.random.PRNGKey(0)
    B, C, H, W = 2, 4, 16, 16
    patch = 4
    x = jax.random.normal(key, (B, C, H, W), dtype=jnp.float32)

    out = pool_embedding(x, patch)
    out = jax.block_until_ready(out)

    ref = _reference(x, patch)
    assert out.shape == (B, patch * patch, C), out.shape
    assert jnp.allclose(out, ref, atol=1e-5, rtol=1e-5), "mismatch vs reference"
    print("KERNEL_OK")
</pallas_src>

<mosaic_0001>
module attributes {stable_mosaic.version = 11 : i64} {
  func.func @_pool_embed_kernel(%arg0: i32, %arg1: i32, %arg2: memref<1x4x256xf32, #tpu.memory_space<vmem>>, %arg3: memref<256x16xf32, #tpu.memory_space<vmem>>, %arg4: memref<1x4x16xf32, #tpu.memory_space<vmem>>) attributes {dimension_semantics = [#tpu.dimension_semantics<parallel>, #tpu.dimension_semantics<parallel>], iteration_bounds = array<i64: 2, 1>, scalar_prefetch = 0 : i64, scratch_operands = 0 : i64, tpu.core_type = #tpu.core_type<tc>, window_params = [{transform_indices = @transform_0, window_bounds = array<i64: 1, 4, 256>}, {pipeline_mode = #tpu.pipeline_mode<synchronous>, transform_indices = @transform_1, window_bounds = array<i64: 256, 16>}, {transform_indices = @transform_2, window_bounds = array<i64: 1, 4, 16>}]} {
    %c0 = arith.constant 0 : index
    %c0_0 = arith.constant 0 : index
    %c0_1 = arith.constant 0 : index
    %0 = vector.load %arg2[%c0, %c0_0, %c0_1] : memref<1x4x256xf32, #tpu.memory_space<vmem>>, vector<1x4x256xf32>
    %1 = vector.shape_cast %0 : vector<1x4x256xf32> to vector<4x256xf32>
    %c0_2 = arith.constant 0 : index
    %c0_3 = arith.constant 0 : index
    %2 = vector.load %arg3[%c0_2, %c0_3] : memref<256x16xf32, #tpu.memory_space<vmem>>, vector<256x16xf32>
    %cst = arith.constant dense<0.000000e+00> : vector<4x16xf32>
    %3 = tpu.matmul %1, %2, %cst {dimension_numbers = #tpu.dot_dimension_numbers<[1], [0], [0], [1], [0, 0, 1, 1], [], []>, precision = #tpu.contract_precision<fp32>} : vector<4x256xf32>, vector<256x16xf32>, vector<4x16xf32> -> vector<4x16xf32>
    %c0_4 = arith.constant 0 : index
    %c0_5 = arith.constant 0 : index
    %c0_6 = arith.constant 0 : index
    %4 = vector.load %arg4[%c0_4, %c0_5, %c0_6] : memref<1x4x16xf32, #tpu.memory_space<vmem>>, vector<1x4x16xf32>
    %5 = vector.shape_cast %4 : vector<1x4x16xf32> to vector<4x16xf32>
    %6 = vector.shape_cast %3 : vector<4x16xf32> to vector<1x4x16xf32>
    tpu.vector_store %arg4[%c0_4, %c0_5, %c0_6], %6 {strides = array<i32>} : memref<1x4x16xf32, #tpu.memory_space<vmem>>, vector<1x4x16xf32>,
    return
  }
  func.func @transform_0(%arg0: i32, %arg1: i32) -> (i32, i32, i32) {
    %c0_i32 = arith.constant 0 : i32
    %c0_i32_0 = arith.constant 0 : i32
    return %arg0, %arg1, %c0_i32 : i32, i32, i32
  }
  func.func @transform_1(%arg0: i32, %arg1: i32) -> (i32, i32) {
    %c0_i32 = arith.constant 0 : i32
    %c0_i32_0 = arith.constant 0 : i32
    %c0_i32_1 = arith.constant 0 : i32
    return %c0_i32, %c0_i32_0 : i32, i32
  }
  func.func @transform_2(%arg0: i32, %arg1: i32) -> (i32, i32, i32) {
    %c0_i32 = arith.constant 0 : i32
    %c0_i32_0 = arith.constant 0 : i32
    return %arg0, %arg1, %c0_i32 : i32, i32, i32
  }
}

</mosaic_0001>

<bundles_post_ra>
// kernel: tpu_custom_call.1
= control target key start
LH: loop header
LB: loop body
LE: loop exit
PB: predicated region body
PF: predicated region fallthrough
CT: control target
= control target key end

     0   :  { %7 = vsyncpa [#allocation3], 0  ;;  %s1854_s0 = inlined_call_operand.vmem [shape: f32[2,4,256], index: 0, kind: input, shape index: {}]   ;;  %s1855_s1 = inlined_call_operand.vmem [shape: f32[256,16], index: 1, kind: input, shape index: {}]   ;;  %s1856_s2 = inlined_call_operand.hbm [shape: f32[2,4,16], index: 2, kind: output, shape index: {}]  }
   0x1   :  { %9 = vsyncpa [#allocation3 + $0x1], 0  ;;  %s1150_s9 = smov 0   ;;  %s1152_s10 = smov 0  }
   0x2   :  { %s1154_s11 = smov 0   ;;  %s1156_s12 = smov 0  }
   0x3   :  { %s1158_s13 = smov 0   ;;  %s1160_s14 = smov 0  }
   0x4 LB: > { %s987_s15 = sadd.s32 4294967295, %s1133_s14   ;;  %s988_s16 = sadd.s32 4294967294, %s1133_s14   ;;  %s1133_s14 = sphi %s1160_s14, %s15_s14   ;;  %s1129_s13 = sphi %s1158_s13, %s1917_s13   ;;  %s1125_s12 = sphi %s1156_s12, %s1916_s12   ;;  %s1121_s11 = sphi %s1154_s11, %s1915_s11   ;;  %s1117_s10 = sphi %s1152_s10, %s1914_s10   ;;  %s1113_s9 = sphi %s1150_s9, %s1913_s9  }
   0x5   : > { %s27_s17 = sadd.s32 1, %s1129_s13  ;;  %s85_s18 = sadd.s32 1, %s1121_s11 }
   0x6   : > { %p29_p0 = scmp.ge.s32.totalorder %s27_s17, 2  ;;  %p95_p1 = scmp.ne.s32.totalorder %s1121_s11, %s1117_s10 }
   0x7   : > { %p96_p2 = scmp.eq.s32.totalorder %s987_s15, 1  ;;  %p101_p3 = scmp.ne.s32.totalorder %s1117_s10, %s1113_s9 }
   0x8   : > { %s1919_s17 = smov (%p29_p0, %s27_s17), 0  ;;  %p102_p5 = scmp.eq.s32.totalorder %s988_s16, 1 }
   0x9   : > { %p1190_p4 = por %p96_p2, %p95_p1  ;;  %s80_s20 = ssub.s32 %s1129_s13, %s1919_s17 }
   0xa   : > { %p991_p6 = scmp.ge.s32.totalorder %s1133_s14, 1  ;;  %p83_p7 = scmp.eq.s32.totalorder %s80_s20, 0 }
   0xb   : > { %p1197_p8 = por %p102_p5, %p101_p3  ;;  %p135_p9 = scmp.lt.s32.totalorder %s1133_s14, 3 }
   0xc   : > { %s1203_s22 = scalar_select %p83_p7, %s1121_s11, %s85_s18  }
   0xd   : > { %p136_p10 = pnand %p991_p6, %p135_p9 }
   0xf   : > { %139 = sbr.rel (%p136_p10) target bundleno = 264 (0x108), region = 28 }
  0x14   : > { %v186_v0 = vld [vmem:[%s1855_s1 + $0x78] sm:$0xff]  ;;  %v185_v1 = vld [vmem:[%s1855_s1 + $0x70] sm:$0xff]  ;;  %v184_v2 = vld [vmem:[%s1855_s1 + $0x68] sm:$0xff]  ;;  %p161_p11 = scmp.lt.s32.totalorder %s1125_s12, 1  ;;  %s158_s16 = sand.u32 1, %s1117_s10   ;;  %vm891_vm0 = vcmask 125952  }
  0x15   : > { %v1215_v3 = vand.u32 4294901760, %v186_v0  ;;  %v1217_v4 = vand.u32 4294901760, %v185_v1  ;;  %v1219_v5 = vand.u32 4294901760, %v184_v2  ;;  %v183_v6 = vld [vmem:[%s1855_s1 + $0x60] sm:$0xff]  ;;  %v182_v7 = vld [vmem:[%s1855_s1 + $0x58] sm:$0xff]  ;;  %v181_v8 = vld [vmem:[%s1855_s1 + $0x50] sm:$0xff] }
  0x16   : > { %v1230_v9 = vand.u32 4294901760, %v183_v6  ;;  %v1232_v10 = vand.u32 4294901760, %v182_v7  ;;  %v1234_v11 = vand.u32 4294901760, %v181_v8  ;;  %v180_v12 = vld [vmem:[%s1855_s1 + $0x48] sm:$0xff]  ;;  %v179_v13 = vld [vmem:[%s1855_s1 + $0x40] sm:$0xff]  ;;  %v178_v18 = vld [vmem:[%s1855_s1 + $0x38] sm:$0xff] }
  0x17   : > { %210 = vmatpush.msra.mxu0 %v1215_v3  ;;  %v1244_v14 = vsub.f32 %v186_v0, %v1215_v3  ;;  %v1247_v15 = vsub.f32 %v185_v1, %v1217_v4  ;;  %406 = vmatpush.msra.mxu3 %v1215_v3  ;;  %v1251_v16 = vsub.f32 %v184_v2, %v1219_v5  ;;  %v1253_v17 = vand.u32 4294901760, %v180_v12  ;;  %s1270_s23 = scalar_select %p161_p11, %s1125_s12, 1  ;;  %v177_v26 = vld [vmem:[%s1855_s1 + $0x30] sm:$0xff]  ;;  %v176_v34 = vld [vmem:[%s1855_s1 + $0x28] sm:$0xff]  ;;  %v175_v42 = vld [vmem:[%s1855_s1 + $0x20] sm:$0xff] }
  0x18   : > { %v1259_v19 = vsub.f32 %v183_v6, %v1230_v9  ;;  %v1262_v20 = vsub.f32 %v182_v7, %v1232_v10  ;;  %v1265_v21 = vsub.f32 %v181_v8, %v1234_v11  ;;  %v1277_v25 = vand.u32 4294901760, %v179_v13  ;;  %v174_v48 = vld [vmem:[%s1855_s1 + $0x18] sm:$0xff]  ;;  %v173_v54 = vld [vmem:[%s1855_s1 + $0x10] sm:$0xff]  ;;  %v172_v62 = vld [vmem:[%s1855_s1 + $0x8] sm:$0xff]  ;;  %s992_s18 = sshll.u32 %s158_s16, 2  ;;  %s996_s20 = sshll.u32 %s1125_s12, 2 }
  0x19   : > { %212 = vmatpush.msra.mxu0 %v1217_v4  ;;  %353 = vmatpush.msra.mxu2 %v1244_v14  ;;  %v252_v22 = vand.u32 4294901760, %v1244_v14  ;;  %v1872_v23 = vand.u32 4294901760, %v1247_v15  ;;  %v1870_v24 = vand.u32 4294901760, %v1251_v16  ;;  %v1284_v28 = vand.u32 4294901760, %v178_v18  ;;  %s999_s28 = sshll.u32 %s1270_s23, 3  ;;  %v202_v60 = vld [vmem:[%s1855_s1 + $0xf8] sm:$0xff]  ;;  %s905_s25 = scalar_lea.hbm %s1856_s2, %s996_s20 }
  0x1a   : > { %408 = vmatpush.msra.mxu3 %v1217_v4  ;;  %v1868_v27 = vand.u32 4294901760, %v1259_v19  ;;  %v1287_v29 = vsub.f32 %v180_v12, %v1253_v17  ;;  %v1866_v33 = vand.u32 4294901760, %v1262_v20  ;;  %v1305_v35 = vand.u32 4294901760, %v177_v26  ;;  %s169_s5 = scalar_lea.vmem %s1854_s0, %s999_s28  ;;  %v171_v6 = vld [vmem:[%s1855_s1] sm:$0xff]  ;;  %v201_v7 = vld [vmem:[%s1855_s1 + $0xf0] sm:$0xff]  ;;  %s160_s26 = scalar_lea.vmem [#allocation2], %s992_s18 }
  0x1b   : > { %214 = vmatpush.msra.mxu0 %v1219_v5  ;;  %356 = vmatpush.msra.mxu2 %v1247_v15  ;;  %v253_v30 = vsub.f32 %v1244_v14, %v252_v22  ;;  %v259_v31 = vsub.f32 %v1247_v15, %v1872_v23  ;;  %v265_v32 = vsub.f32 %v1251_v16, %v1870_v24  ;;  %v1865_v36 = vand.u32 4294901760, %v1265_v21  ;;  %v170_v55 = vld [vmem:[%s169_s5] sm:$0xff]  ;;  %s907_s27 = sshll.u32 %s160_s26, 4  ;;  %s909_s28 = sshll.u32 %s905_s25, 4  ;;  %s908_s27 = int_to_ptr.vmem [resolvable:$true] %s907_s27  ;;  %s910_s28 = int_to_ptr.hbm [resolvable:$true] %s909_s28 }
  0x1c   : > { %410 = vmatpush.msra.mxu3 %v1219_v5  ;;  %v271_v39 = vsub.f32 %v1259_v19, %v1868_v27  ;;  %v1315_v40 = vsub.f32 %v179_v13, %v1277_v25  ;;  %v1318_v41 = vand.u32 4294901760, %v176_v34  ;;  %v277_v44 = vsub.f32 %v1262_v20, %v1866_v33  ;;  %204 = vst [vmem:[#allocation1] ss:$2 sm:$0xff] %v170_v55  ;;  %s894_s12 = scalar_lea.sflag [#allocation3], %s158_s16  ;;  %s1069_s29 = sshra.s32 %s910_s28, 4  ;;  %s1070_s29 = int_to_ptr.hbm [resolvable:$true] %s1069_s29 }
  0x1d   : > { %216 = vmatpush.msra.mxu0 %v1230_v9  ;;  %v254_v37 = vand.u32 4294901760, %v253_v30  ;;  %359 = vmatpush.msra.mxu2 %v1251_v16  ;;  %v260_v38 = vand.u32 4294901760, %v259_v31  ;;  %v266_v43 = vand.u32 4294901760, %v265_v32  ;;  %v1863_v45 = vand.u32 4294901760, %v1287_v29  ;;  %s1071_s30 = scalar_lea.hbm %s1070_s29, 4  ;;  %s1075_s5 = scalar_lea.hbm %s1856_s2, 8 }
  0x1e   : > { %412 = vmatpush.msra.mxu3 %v1230_v9  ;;  %v1329_v46 = vsub.f32 %v178_v18, %v1284_v28  ;;  %v283_v47 = vsub.f32 %v1265_v21, %v1865_v36  ;;  %v272_v49 = vand.u32 4294901760, %v271_v39  ;;  %v1343_v50 = vand.u32 4294901760, %v175_v42  ;;  %p1072_p12 = scmp.ne.s32.totalorder %s1070_s29, %s1071_s30  ;;  %p1076_p1 = scmp.lt.s32.totalorder %s1070_s29, %s1856_s2 }
  0x1f   : > { %218 = vmatpush.msra.mxu0 %v1232_v10  ;;  %255 = vmatpush.msra.mxu1 %v254_v37  ;;  %v1862_v51 = vand.u32 4294901760, %v1315_v40  ;;  %v1347_v52 = vsub.f32 %v177_v26, %v1305_v35  ;;  %v1352_v53 = vsub.f32 %v176_v34, %v1318_v41  ;;  %v278_v56 = vand.u32 4294901760, %v277_v44  ;;  %v200_v34 = vld [vmem:[%s1855_s1 + $0xe8] sm:$0xff]  ;;  %p1077_p2 = scmp.lt.s32.totalorder %s1075_s5, %s1071_s30 }
  0x20   : > { %362 = vmatpush.msra.mxu2 %v1259_v19  ;;  %414 = vmatpush.msra.mxu3 %v1232_v10  ;;  %v289_v57 = vsub.f32 %v1287_v29, %v1863_v45  ;;  %v1361_v58 = vand.u32 4294901760, %v174_v48  ;;  %v1861_v59 = vand.u32 4294901760, %v1329_v46  ;;  %v284_v61 = vand.u32 4294901760, %v283_v47  ;;  %v199_v47 = vld [vmem:[%s1855_s1 + $0xe0] sm:$0xff]  ;;  %p1073_p13 = pnand %p1072_p12, %p1190_p4 }
  0x21   : > { %220 = vmatpush.msra.mxu0 %v1234_v11  ;;  %261 = vmatpush.msra.mxu1 %v260_v38  ;;  %v295_v63 = vsub.f32 %v1315_v40, %v1862_v51  ;;  %v1376_v0 = vand.u32 4294901760, %v173_v54  ;;  %v1859_v1 = vand.u32 4294901760, %v1347_v52  ;;  %v1380_v2 = vsub.f32 %v175_v42, %v1343_v50  ;;  %v195_v45 = vld [vmem:[%s1855_s1 + $0xc0] sm:$0xff]  ;;  %p1078_p3 = por %p1077_p2, %p1076_p1 }
  0x22   : > { %365 = vmatpush.msra.mxu2 %v1262_v20  ;;  %416 = vmatpush.msra.mxu3 %v1234_v11  ;;  %v1858_v8 = vand.u32 4294901760, %v1352_v53  ;;  %v1391_v12 = vand.u32 4294901760, %v202_v60  ;;  %v290_v13 = vand.u32 4294901760, %v289_v57  ;;  %v301_v18 = vsub.f32 %v1329_v46, %v1861_v59  ;;  %p1074_p0 = pneg %p1073_p13 }
  0x23   : > { %222 = vmatpush.msra.mxu0 %v1253_v17  ;;  %267 = vmatpush.msra.mxu1 %v266_v43  ;;  %v1397_v26 = vand.u32 4294901760, %v172_v62  ;;  %v1400_v30 = vsub.f32 %v174_v48, %v1361_v58  ;;  %v1404_v31 = vand.u32 4294901760, %v171_v6  ;;  %v1406_v32 = vand.u32 4294901760, %v201_v7 }
  0x24   : > { %368 = vmatpush.msra.mxu2 %v1265_v21  ;;  %418 = vmatpush.msra.mxu3 %v1253_v17  ;;  %v296_v37 = vand.u32 4294901760, %v295_v63  ;;  %v307_v38 = vsub.f32 %v1347_v52, %v1859_v1  ;;  %v1857_v39 = vand.u32 4294901760, %v1380_v2  ;;  %v1417_v42 = vsub.f32 %v173_v54, %v1376_v0  ;;  %p1079_p5 = pnand %p1078_p3, %p1074_p0 }
  0x25   : > { %224 = vmatpush.msra.mxu0 %v1277_v25  ;;  %273 = vmatpush.msra.mxu1 %v272_v49  ;;  %v313_v43 = vsub.f32 %v1352_v53, %v1858_v8  ;;  %v1425_v44 = vsub.f32 %v202_v60, %v1391_v12  ;;  %v302_v48 = vand.u32 4294901760, %v301_v18  ;;  %v1860_v49 = vand.u32 4294901760, %v1400_v30  ;;  %v198_v60 = vld [vmem:[%s1855_s1 + $0xd8] sm:$0xff]  ;;  %v197_v18 = vld [vmem:[%s1855_s1 + $0xd0] sm:$0xff]  ;;  %v196_v8 = vld [vmem:[%s1855_s1 + $0xc8] sm:$0xff] }
  0x26   : > { %371 = vmatpush.msra.mxu2 %v1287_v29  ;;  %420 = vmatpush.msra.mxu3 %v1277_v25  ;;  %v1433_v54 = vsub.f32 %v172_v62, %v1397_v26  ;;  %v1435_v55 = vand.u32 4294901760, %v200_v34  ;;  %v1443_v57 = vsub.f32 %v201_v7, %v1406_v32  ;;  %v319_v62 = vsub.f32 %v1380_v2, %v1857_v39 }
  0x27   : > { %226 = vmatpush.msra.mxu0 %v1284_v28  ;;  %279 = vmatpush.msra.mxu1 %v278_v56  ;;  %v1440_v56 = vsub.f32 %v171_v6, %v1404_v31  ;;  %v1864_v63 = vand.u32 4294901760, %v1417_v42  ;;  %v314_v6 = vand.u32 4294901760, %v313_v43  ;;  %v1867_v7 = vand.u32 4294901760, %v1425_v44 }
  0x28   : > { %374 = vmatpush.msra.mxu2 %v1315_v40  ;;  %422 = vmatpush.msra.mxu3 %v1284_v28  ;;  %1883 = vst [vmem:[#allocation5_spill] sm:$0xff] %v1435_v55  ;;  %v1467_v39 = vsub.f32 %v200_v34, %v1435_v55  ;;  %v1469_v43 = vand.u32 4294901760, %v198_v60  ;;  %v1871_v1 = vand.u32 4294901760, %v1443_v57  ;;  %v1485_v51 = vand.u32 4294901760, %v197_v18 }
  0x29   : > { %228 = vmatpush.msra.mxu0 %v1305_v35  ;;  %285 = vmatpush.msra.mxu1 %v284_v61  ;;  %v308_v61 = vand.u32 4294901760, %v307_v38  ;;  %v1869_v38 = vand.u32 4294901760, %v1433_v54  ;;  %v331_v34 = vsub.f32 %v1417_v42, %v1864_v63  ;;  %v1510_v27 = vand.u32 4294901760, %v195_v45 }
  0x2a   : > { %377 = vmatpush.msra.mxu2 %v1329_v46  ;;  %424 = vmatpush.msra.mxu3 %v1305_v35  ;;  %v1874_v36 = vand.u32 4294901760, %v1467_v39  ;;  %v1503_v33 = vsub.f32 %v198_v60, %v1469_v43  ;;  %v1521_v24 = vsub.f32 %v197_v18, %v1485_v51 }
  0x2b   : > { %230 = vmatpush.msra.mxu0 %v1318_v41  ;;  %291 = vmatpush.msra.mxu1 %v290_v13  ;;  %v1453_v13 = vand.u32 4294901760, %v199_v47  ;;  %v337_v63 = vsub.f32 %v1433_v54, %v1869_v38 }
  0x2c   : > { %380 = vmatpush.msra.mxu2 %v1347_v52  ;;  %426 = vmatpush.msra.mxu3 %v1318_v41  ;;  %v606_v18 = vsub.f32 %v1467_v39, %v1874_v36  ;;  %v1876_v14 = vand.u32 4294901760, %v1503_v33 }
  0x2d   : > { %232 = vmatpush.msra.mxu0 %v1343_v50  ;;  %297 = vmatpush.msra.mxu1 %v296_v37  ;;  %v325_v37 = vsub.f32 %v1400_v30, %v1860_v49  ;;  %v320_v49 = vand.u32 4294901760, %v319_v62  ;;  %v1483_v59 = vsub.f32 %v199_v47, %v1453_v13  ;;  %v1495_v62 = vand.u32 4294901760, %v196_v8 }
  0x2e   : > { %383 = vmatpush.msra.mxu2 %v1352_v53  ;;  %428 = vmatpush.msra.mxu3 %v1343_v50 }
  0x2f   : > { %234 = vmatpush.msra.mxu0 %v1361_v58  ;;  %303 = vmatpush.msra.mxu1 %v302_v48  ;;  %v1873_v48 = vand.u32 4294901760, %v1440_v56  ;;  %v326_v47 = vand.u32 4294901760, %v325_v37  ;;  %v332_v37 = vand.u32 4294901760, %v331_v34  ;;  %v1875_v38 = vand.u32 4294901760, %v1483_v59 }
  0x30   : > { %386 = vmatpush.msra.mxu2 %v1380_v2  ;;  %430 = vmatpush.msra.mxu3 %v1361_v58  ;;  %v1527_v23 = vsub.f32 %v196_v8, %v1495_v62  ;;  %v338_v34 = vand.u32 4294901760, %v337_v63  ;;  %v192_v63 = vld [vmem:[%s1855_s1 + $0xa8] sm:$0xff] }
  0x31   : > { %236 = vmatpush.msra.mxu0 %v1376_v0  ;;  %309 = vmatpush.msra.mxu1 %v308_v61  ;;  %v594_v61 = vsub.f32 %v1425_v44, %v1867_v7  ;;  %v600_v7 = vsub.f32 %v1443_v57, %v1871_v1  ;;  %v343_v60 = vsub.f32 %v1440_v56, %v1873_v48 }
  0x32   : > { %389 = vmatpush.msra.mxu2 %v1400_v30  ;;  %432 = vmatpush.msra.mxu3 %v1376_v0  ;;  %v1543_v48 = vsub.f32 %v195_v45, %v1510_v27  ;;  %v612_v36 = vsub.f32 %v1483_v59, %v1875_v38  ;;  %v618_v38 = vsub.f32 %v1503_v33, %v1876_v14  ;;  %v1887_v14 = vand.u32 4294901760, %v1521_v24 }
  0x33   : > { %238 = vmatpush.msra.mxu0 %v1397_v26  ;;  %315 = vmatpush.msra.mxu1 %v314_v6  ;;  %v194_v6 = vld [vmem:[%s1855_s1 + $0xb8] sm:$0xff]  ;;  %v595_v1 = vand.u32 4294901760, %v594_v61  ;;  %v1884_v61 = vand.u32 4294901760, %v1247_v15  ;;  %v601_v8 = vand.u32 4294901760, %v600_v7  ;;  %v1885_v7 = vand.u32 4294901760, %v1251_v16 }
  0x34   : > { %392 = vmatpush.msra.mxu2 %v1417_v42  ;;  %434 = vmatpush.msra.mxu3 %v1397_v26  ;;  %v1568_v16 = vand.u32 4294901760, %v192_v63 }
  0x35   : > { %240 = vmatpush.msra.mxu0 %v1404_v31  ;;  %321 = vmatpush.msra.mxu1 %v320_v49  ;;  %v193_v49 = vld [vmem:[%s1855_s1 + $0xb0] sm:$0xff] }
  0x36   : > { %395 = vmatpush.msra.mxu2 %v1433_v54  ;;  %436 = vmatpush.msra.mxu3 %v1404_v31 }
  0x37   : > { %447 = vmatpush.msrb.mxu0 %v252_v22  ;;  %327 = vmatpush.msra.mxu1 %v326_v47  ;;  %v1537_v22 = vand.u32 4294901760, %v194_v6  ;;  %v344_v47 = vand.u32 4294901760, %v343_v60  ;;  %v607_v60 = vand.u32 4294901760, %v606_v18  ;;  %v613_v18 = vand.u32 4294901760, %v612_v36 }
  0x38   : > { %398 = vmatpush.msra.mxu2 %v1440_v56  ;;  %596 = vmatpush.msrb.mxu3 %v595_v1  ;;  %v1886_v1 = vand.u32 4294901760, %v1259_v19  ;;  %v619_v36 = vand.u32 4294901760, %v618_v38  ;;  %v189_v38 = vld [vmem:[%s1855_s1 + $0x90] sm:$0xff] }
  0x39   : > { %451 = vmatpush.msrb.mxu0 %v1884_v61  ;;  %333 = vmatpush.msra.mxu1 %v332_v37  ;;  %v1553_v61 = vand.u32 4294901760, %v193_v49  ;;  %v191_v37 = vld [vmem:[%s1855_s1 + $0xa0] sm:$0xff]  ;;  %v1566_v15 = vsub.f32 %v194_v6, %v1537_v22  ;;  %v624_v6 = vsub.f32 %v1521_v24, %v1887_v14 }
  0x3a   : > { %551 = vmatpush.msrb.mxu2 %v1391_v12  ;;  %602 = vmatpush.msrb.mxu3 %v601_v8  ;;  %v1583_v19 = vand.u32 4294901760, %v191_v37  ;;  %v1888_v8 = vand.u32 4294901760, %v1262_v20  ;;  %v1890_v20 = vand.u32 4294901760, %v1265_v21 }
  0x3b   : > { %455 = vmatpush.msrb.mxu0 %v1885_v7  ;;  %339 = vmatpush.msra.mxu1 %v338_v34  ;;  %v190_v34 = vld [vmem:[%s1855_s1 + $0x98] sm:$0xff]  ;;  %v1581_v45 = vsub.f32 %v193_v49, %v1553_v61  ;;  %v205_v7 = vld.sshfl [vmem:[#allocation1] sm:$0xff pattern:$0x75316420]  ;;  %v1879_v14 = vand.u32 4294901760, %v1566_v15  ;;  %v1594_v49 = vsub.f32 %v192_v63, %v1568_v16  ;;  %v625_v63 = vand.u32 4294901760, %v624_v6 }
  0x3c   : > { %553 = vmatpush.msrb.mxu2 %v1406_v32  ;;  %608 = vmatpush.msrb.mxu3 %v607_v60  ;;  %v1612_v21 = vand.u32 4294901760, %v205_v7  ;;  %v1625_v6 = vand.u32 4294901760, %v189_v38 }
  0x3d   : > { %459 = vmatpush.msrb.mxu0 %v1886_v1  ;;  %345 = vmatpush.msra.mxu1 %v344_v47  ;;  %v1889_v1 = vand.u32 4294901760, %v1527_v23  ;;  %v1880_v60 = vand.u32 4294901760, %v1581_v45 }
  0x3e   : > { %555 = vmatpush.msrb.mxu2 %v1435_v55  ;;  %v1596_v55 = vand.u32 4294901760, %v190_v34  ;;  %614 = vmatpush.msrb.mxu3 %v613_v18  ;;  %v653_v18 = vand.u32 4294901760, %v1594_v49 }
  0x3f   : > { %463 = vmatpush.msrb.mxu0 %v1888_v8  ;;  %514 = vmatpush.msrb.mxu1 %v1215_v3  ;;  %v630_v47 = vsub.f32 %v1527_v23, %v1889_v1  ;;  %v1891_v3 = vand.u32 4294901760, %v1543_v48  ;;  %v1610_v1 = vsub.f32 %v191_v37, %v1583_v19  ;;  %v642_v37 = vsub.f32 %v1566_v15, %v1879_v14 }
  0x40   : > { %557 = vmatpush.msrb.mxu2 %v1453_v13  ;;  %620 = vmatpush.msrb.mxu3 %v619_v36  ;;  %v648_v36 = vsub.f32 %v1581_v45, %v1880_v60  ;;  %v1639_v14 = vsub.f32 %v205_v7, %v1612_v21  ;;  %v654_v7 = vsub.f32 %v1594_v49, %v653_v18  ;;  %v1895_v60 = vand.u32 4294901760, %v1347_v52 }
  0x41   : > { %467 = vmatpush.msrb.mxu0 %v1890_v20  ;;  %516 = vmatpush.msrb.mxu1 %v1217_v4  ;;  %v636_v8 = vsub.f32 %v1543_v48, %v1891_v3  ;;  %v1892_v4 = vand.u32 4294901760, %v1287_v29  ;;  %v631_v20 = vand.u32 4294901760, %v630_v47  ;;  %v188_v3 = vld [vmem:[%s1855_s1 + $0x88] sm:$0xff]  ;;  %v1628_v29 = vsub.f32 %v190_v34, %v1596_v55 }
  0x42   : > { %559 = vmatpush.msrb.mxu2 %v1469_v43  ;;  %626 = vmatpush.msrb.mxu3 %v625_v63  ;;  %v1641_v34 = vand.u32 4294901760, %v188_v3  ;;  %v1896_v52 = vand.u32 4294901760, %v1352_v53 }
  0x43   : > { %471 = vmatpush.msrb.mxu0 %v1892_v4  ;;  %518 = vmatpush.msrb.mxu1 %v1219_v5  ;;  %v1893_v5 = vand.u32 4294901760, %v1315_v40  ;;  %v637_v47 = vand.u32 4294901760, %v636_v8  ;;  %v659_v4 = vand.u32 4294901760, %v1610_v1  ;;  %v187_v40 = vld [vmem:[%s1855_s1 + $0x80] sm:$0xff]  ;;  %v643_v8 = vand.u32 4294901760, %v642_v37 }
  0x44   : > { %561 = vmatpush.msrb.mxu2 %v1485_v51  ;;  %632 = vmatpush.msrb.mxu3 %v631_v20  ;;  %v665_v63 = vand.u32 4294901760, %v1628_v29  ;;  %v243_v37 = vand.u32 4294901760, %v1639_v14 }
  0x45   : > { %475 = vmatpush.msrb.mxu0 %v1893_v5  ;;  %520 = vmatpush.msrb.mxu1 %v1230_v9  ;;  %v1894_v9 = vand.u32 4294901760, %v1329_v46  ;;  %v1655_v5 = vsub.f32 %v189_v38, %v1625_v6  ;;  %v1660_v46 = vand.u32 4294901760, %v187_v40  ;;  %v660_v20 = vsub.f32 %v1610_v1, %v659_v4 }
  0x46   : > { %563 = vmatpush.msrb.mxu2 %v1495_v62  ;;  %638 = vmatpush.msrb.mxu3 %v637_v47  ;;  %v1668_v38 = vsub.f32 %v188_v3, %v1641_v34  ;;  %v666_v47 = vsub.f32 %v1628_v29, %v665_v63  ;;  %v244_v3 = vsub.f32 %v1639_v14, %v243_v37 }
  0x47   : > { %479 = vmatpush.msrb.mxu0 %v1894_v9  ;;  %522 = vmatpush.msrb.mxu1 %v1232_v10  ;;  %v649_v10 = vand.u32 4294901760, %v648_v36  ;;  %v671_v36 = vand.u32 4294901760, %v1655_v5  ;;  %v1897_v9 = vand.u32 4294901760, %v1380_v2  ;;  %v1682_v53 = vsub.f32 %v187_v40, %v1660_v46 }
  0x48   : > { %565 = vmatpush.msrb.mxu2 %v1510_v27  ;;  %644 = vmatpush.msrb.mxu3 %v643_v8  ;;  %v677_v8 = vand.u32 4294901760, %v1668_v38  ;;  %v1899_v40 = vand.u32 4294901760, %v1417_v42  ;;  %v1901_v42 = vand.u32 4294901760, %v1440_v56 }
  0x49   : > { %483 = vmatpush.msrb.mxu0 %v1895_v60  ;;  %524 = vmatpush.msrb.mxu1 %v1234_v11  ;;  %v206_v11 = vld.sshfl [vmem:[#allocation1 + $0x8] sm:$0xff pattern:$0x75316420]  ;;  %v655_v60 = vand.u32 4294901760, %v654_v7  ;;  %v672_v2 = vsub.f32 %v1655_v5, %v671_v36 }
  0x4a   : > { %567 = vmatpush.msrb.mxu2 %v1537_v22  ;;  %650 = vmatpush.msrb.mxu3 %v649_v10  ;;  %v1687_v7 = vand.u32 4294901760, %v206_v11  ;;  %v683_v10 = vand.u32 4294901760, %v1682_v53 }
  0x4b   : > { %487 = vmatpush.msrb.mxu0 %v1896_v52  ;;  %526 = vmatpush.msrb.mxu1 %v1253_v17  ;;  %v661_v17 = vand.u32 4294901760, %v660_v20  ;;  %v1898_v52 = vand.u32 4294901760, %v1400_v30  ;;  %v245_v30 = vand.u32 4294901760, %v244_v3 }
  0x4c   : > { %569 = vmatpush.msrb.mxu2 %v1553_v61  ;;  %656 = vmatpush.msrb.mxu3 %v655_v60  ;;  %v1705_v20 = vsub.f32 %v206_v11, %v1687_v7  ;;  %v1900_v60 = vand.u32 4294901760, %v1433_v54 }
  0x4d   : > { %491 = vmatpush.msrb.mxu0 %v1897_v9  ;;  %528 = vmatpush.msrb.mxu1 %v1277_v25  ;;  %v667_v25 = vand.u32 4294901760, %v666_v47  ;;  %v684_v47 = vsub.f32 %v1682_v53, %v683_v10 }
  0x4e   : > { %571 = vmatpush.msrb.mxu2 %v1568_v16  ;;  %662 = vmatpush.msrb.mxu3 %v661_v17  ;;  %v584_v11 = vand.u32 4294901760, %v1705_v20 }
  0x4f   : > { %495 = vmatpush.msrb.mxu0 %v1898_v52  ;;  %530 = vmatpush.msrb.mxu1 %v1284_v28  ;;  %v678_v28 = vsub.f32 %v1668_v38, %v677_v8 }
  0x50   : > { %573 = vmatpush.msrb.mxu2 %v1583_v19  ;;  %668 = vmatpush.msrb.mxu3 %v667_v25 }
  0x51   : > { %499 = vmatpush.msrb.mxu0 %v1899_v40  ;;  %532 = vmatpush.msrb.mxu1 %v1305_v35  ;;  %v673_v35 = vand.u32 4294901760, %v672_v2  ;;  %v679_v54 = vand.u32 4294901760, %v678_v28 }
  0x52   : > { %575 = vmatpush.msrb.mxu2 %v1596_v55  ;;  %246 = vmatmul.f32.vlgmr.msra.gmra.mxu0 %v245_v30 }
  0x53   : > { %503 = vmatpush.msrb.mxu0 %v1900_v60  ;;  %534 = vmatpush.msrb.mxu1 %v1318_v41  ;;  %v685_v41 = vand.u32 4294901760, %v684_v47 }
  0x54   : > { %577 = vmatpush.msrb.mxu2 %v1625_v6  ;;  %674 = vmatpush.msrb.mxu3 %v673_v35 }
  0x55   : > { %507 = vmatpush.msrb.mxu0 %v1901_v42  ;;  %536 = vmatpush.msrb.mxu1 %v1343_v50  ;;  %v585_v50 = vsub.f32 %v1705_v20, %v584_v11 }
  0x56   : > { %579 = vmatpush.msrb.mxu2 %v1641_v34  ;;  %680 = vmatpush.msrb.mxu3 %v679_v54 }
  0x57   : > { %694 = vmatpush.msra.mxu0 %v1425_v44  ;;  %538 = vmatpush.msrb.mxu1 %v1361_v58  ;;  %v1902_v58 = vand.u32 4294901760, %v1425_v44  ;;  %v586_v56 = vand.u32 4294901760, %v585_v50  ;;  %v1904_v44 = vand.u32 4294901760, %v1467_v39 }
  0x58   : > { %401 = vmatmul.f32.vlgmr.msra.gmra.mxu2 %v1639_v14  ;;  %440 = vmatmul.f32.vlgmr.msra.gmra.mxu3 %v243_v37 }
  0x59   : > { %697 = vmatpush.msra.mxu0 %v1443_v57  ;;  %540 = vmatpush.msrb.mxu1 %v1376_v0  ;;  %v1903_v0 = vand.u32 4294901760, %v1443_v57  ;;  %v1906_v57 = vld [vmem:[#allocation5_spill] sm:$0xff] }
  0x5a   : > { %581 = vmatpush.msrb.mxu2 %v1660_v46  ;;  %686 = vmatpush.msrb.mxu3 %v685_v41 }
  0x5b   : > { %700 = vmatpush.msra.mxu0 %v1467_v39  ;;  %542 = vmatpush.msrb.mxu1 %v1397_v26  ;;  %v1905_v26 = vand.u32 4294901760, %v1483_v59 }
  0x5c   : > { %788 = vmatpush.msra.mxu2 %v1902_v58  ;;  %347 = vmatmul.f32.vlgmr.msra.gmra.mxu1 %v1612_v21 }
  0x5d   : > { %703 = vmatpush.msra.mxu0 %v1483_v59  ;;  %855 = vmatpush.msra.mxu3 %v1391_v12  ;;  %v1908_v59 = vand.u32 4294901760, %v1521_v24 }
  0x5e   : > { %792 = vmatpush.msra.mxu2 %v1903_v0  ;;  %544 = vmatpush.msrb.mxu1 %v1404_v31  ;;  %v1910_v31 = vand.u32 4294901760, %v1543_v48 }
  0x5f   : > { %706 = vmatpush.msra.mxu0 %v1503_v33  ;;  %857 = vmatpush.msra.mxu3 %v1406_v32 }
  0x60   : > { %747 = vmatpush.msra.mxu1 %v1391_v12  ;;  %796 = vmatpush.msra.mxu2 %v1904_v44  ;;  %v1907_v12 = vand.u32 4294901760, %v1503_v33  ;;  %v1909_v33 = vand.u32 4294901760, %v1527_v23 }
  0x61   : > { %587 = vmatmul.f32.vlgmr.msrb.gmra.mxu2 %v586_v56  ;;  %709 = vmatpush.msra.mxu0 %v1521_v24  ;;  %v1911_v24 = vand.u32 4294901760, %v1566_v15 }
  0x62   : > { %749 = vmatpush.msra.mxu1 %v1406_v32  ;;  %800 = vmatpush.msra.mxu2 %v1905_v26 }
  0x63   : > { %859 = vmatpush.msra.mxu3 %v1906_v57  ;;  %509 = vmatmul.f32.vlgmr.msrb.gmra.mxu0 %v1612_v21 }
  0x64   : > { %688 = vmatmul.f32.vlgmr.msrb.gmra.mxu3 %v1687_v7  ;;  %712 = vmatpush.msra.mxu0 %v1527_v23  ;;  %v1912_v23 = vand.u32 4294901760, %v1581_v45 }
  0x65   : > { %751 = vmatpush.msra.mxu1 %v1906_v57  ;;  %804 = vmatpush.msra.mxu2 %v1907_v12 }
  0x66   : > { %861 = vmatpush.msra.mxu3 %v1453_v13  ;;  %546 = vmatmul.f32.vlgmr.msrb.gmra.mxu1 %v1612_v21 }
  0x67   : > { %715 = vmatpush.msra.mxu0 %v1543_v48  ;;  %753 = vmatpush.msra.mxu1 %v1453_v13 }
  0x68   : > { %808 = vmatpush.msra.mxu2 %v1908_v59  ;;  %863 = vmatpush.msra.mxu3 %v1469_v43 }
  0x69   : > { %718 = vmatpush.msra.mxu0 %v1566_v15  ;;  %755 = vmatpush.msra.mxu1 %v1469_v43 }
  0x6a   : > { %812 = vmatpush.msra.mxu2 %v1909_v33  ;;  %865 = vmatpush.msra.mxu3 %v1485_v51 }
  0x6b   : > { %721 = vmatpush.msra.mxu0 %v1581_v45  ;;  %757 = vmatpush.msra.mxu1 %v1485_v51 }
  0x6c   : > { %816 = vmatpush.msra.mxu2 %v1910_v31  ;;  %867 = vmatpush.msra.mxu3 %v1495_v62 }
  0x6d   : > { %724 = vmatpush.msra.mxu0 %v1594_v49  ;;  %759 = vmatpush.msra.mxu1 %v1495_v62 }
  0x6e   : > { %820 = vmatpush.msra.mxu2 %v1911_v24  ;;  %869 = vmatpush.msra.mxu3 %v1510_v27 }
  0x6f   : > { %727 = vmatpush.msra.mxu0 %v1610_v1  ;;  %761 = vmatpush.msra.mxu1 %v1510_v27 }
  0x70   : > { %824 = vmatpush.msra.mxu2 %v1912_v23  ;;  %871 = vmatpush.msra.mxu3 %v1537_v22 }
  0x71   : > { %730 = vmatpush.msra.mxu0 %v1628_v29  ;;  %763 = vmatpush.msra.mxu1 %v1537_v22 }
  0x72   : > { %828 = vmatpush.msra.mxu2 %v653_v18  ;;  %873 = vmatpush.msra.mxu3 %v1553_v61 }
  0x73   : > { %733 = vmatpush.msra.mxu0 %v1655_v5  ;;  %765 = vmatpush.msra.mxu1 %v1553_v61 }
  0x74   : > { %832 = vmatpush.msra.mxu2 %v659_v4  ;;  %875 = vmatpush.msra.mxu3 %v1568_v16 }
  0x75   : > { %736 = vmatpush.msra.mxu0 %v1668_v38  ;;  %767 = vmatpush.msra.mxu1 %v1568_v16 }
  0x76   : > { %836 = vmatpush.msra.mxu2 %v665_v63  ;;  %877 = vmatpush.msra.mxu3 %v1583_v19 }
  0x77   : > { %739 = vmatpush.msra.mxu0 %v1682_v53  ;;  %769 = vmatpush.msra.mxu1 %v1583_v19 }
  0x78   : > { %840 = vmatpush.msra.mxu2 %v671_v36  ;;  %879 = vmatpush.msra.mxu3 %v1596_v55 }
  0x79   : > { %742 = vmatmul.f32.vlgmr.msra.gmra.mxu0 %v1705_v20  ;;  %771 = vmatpush.msra.mxu1 %v1596_v55 }
  0x7a   : > { %844 = vmatpush.msra.mxu2 %v677_v8  ;;  %881 = vmatpush.msra.mxu3 %v1625_v6 }
  0x7b   : > { %773 = vmatpush.msra.mxu1 %v1625_v6 }
  0x7c   : > { %848 = vmatpush.msra.mxu2 %v683_v10  ;;  %883 = vmatpush.msra.mxu3 %v1641_v34 }
  0x7d   : > { %850 = vmatmul.f32.vlgmr.msra.gmra.mxu2 %v1687_v7  ;;  %775 = vmatpush.msra.mxu1 %v1641_v34 }
  0x7e   : > { %885 = vmatpush.msra.mxu3 %v1660_v46 }
  0x7f   : > { %887 = vmatmul.f32.vlgmr.msra.gmra.mxu3 %v1687_v7  ;;  %777 = vmatpush.msra.mxu1 %v1660_v46 }
  0x80   : > { %781 = vmatmul.f32.vlgmr.msra.gmra.mxu1 %v584_v11 }
  0xcf   : > { %v247_v51 = vpop.f32.mrf.mxu0 }
  0xd9   : > { %v348_v27 = vpop.f32.mrf.mxu1 }
  0xda   : > { %v349_v32 = vadd.f32 %v348_v27, %v247_v51 }
  0xdb   : > { %v402_v39 = vpop.f32.mrf.mxu2  ;;  %v441_v13 = vpop.f32.mrf.mxu3 }
  0xdc   : > { %v403_v55 = vadd.f32 %v402_v39, %v349_v32 }
  0xde   : > { %v442_v43 = vadd.f32 %v441_v13, %v403_v55 }
  0xe0   : > { %v510_v48 = vpop.f32.mrf.mxu0 }
  0xe1   : > { %v511_v62 = vadd.f32 %v510_v48, %v442_v43 }
  0xe3   : > { %v547_v22 = vpop.f32.mrf.mxu1 }
  0xe4   : > { %v548_v15 = vadd.f32 %v547_v22, %v511_v62  ;;  %v588_v61 = vpop.f32.mrf.mxu2 }
  0xe6   : > { %v589_v45 = vadd.f32 %v588_v61, %v548_v15 }
  0xe7   : > { %v689_v16 = vpop.f32.mrf.mxu3 }
  0xe8   : > { %v690_v14 = vadd.f32 %v689_v16, %v589_v45 }
  0xf6   : > { %v743_v19 = vpop.f32.mrf.mxu0 }
  0xf7   : > { %v744_v49 = vadd.f32 %v743_v19, %v690_v14 }
  0xfd   : > { %v782_v1 = vpop.f32.mrf.mxu1 }
  0xfe   : > { %v783_v21 = vadd.f32 %v782_v1, %v744_v49 }
 0x100   : > { %v851_v18 = vpop.f32.mrf.mxu2 }
 0x101   : > { %v852_v6 = vadd.f32 %v851_v18, %v783_v21 }
 0x102   : > { %v888_v29 = vpop.f32.mrf.mxu3 }
 0x103   : > { %v889_v4 = vadd.f32 %v888_v29, %v852_v6 }
 0x105   : > { %892 = vst.msk [vmem:[%s160_s26] sm:$0xf] %vm891_vm0, %v889_v4 }
 0x106   : > { %1082 = shalt.err (!%p1079_p5)
}
 0x107   : > { %1000 = dma.vmem_to_hbm [thread:$0]  (%p1190_p4), %s908_s27, 64, %s910_s28, %s894_s12  }
 0x108 PF: > { %p1006_p6 = scmp.ge.s32.totalorder %s1133_s14, 2  ;;  %s921_s8 = sand.u32 1, %s1113_s9  }
 0x109   : > { %s922_s15 = scalar_lea.sflag [#allocation3], %s921_s8 }
 0x10a   : > { %p1003_p7 = pnand %p1006_p6, %p1197_p8 }
 0x10c   : > { %p1004_p9 = pneg %p1003_p7 }
 0x10e   : > { %1108 = dma.done.wait (%p1004_p9), %s922_s15, 64  }
 0x10f   : > { %1110 = vsyncadd (%p1004_p9), %s922_s15, 4294967232  ;;  %s15_s14 = sadd.s32 1, %s1133_s14   ;;  %s1913_s9 = smov %s1117_s10 }
 0x110   : > { %p12_p10 = scmp.ge.s32.totalorder %s15_s14, 4   ;;  %s1914_s10 = smov %s1121_s11 }
 0x111   : > { %s1915_s11 = smov %s1203_s22  ;;  %s1916_s12 = smov %s1129_s13 }
 0x112   : > { %s1917_s13 = smov %s1919_s17  ;;  %14 = sbr.rel (!%p12_p10) target bundleno = 4 (0x4), region = 63 }
 0x117   :  { %928 = vsyncpa [#allocation3], 1 }
 0x118   :  { %930 = vsyncpa [#allocation3 + $0x1], 1 }

</bundles_post_ra>
